<compile_context>
chip_gen: v7x
topology: tpu7x:2x2x1
jax: 0.10.0
libtpu: 0.0.40
codegen_flags: <defaults>
</compile_context>

<pallas_src>
import functools

import numpy as np
import jax
import jax.numpy as jnp
from jax.experimental import pallas as pl
from jax.experimental.pallas import tpu as pltpu


# ---------------------------------------------------------------------------
# noise transforms (elementwise; EUP/VPU ops only)
# ---------------------------------------------------------------------------
def _exp_transform(x):
    return jnp.exp(x)


def _softplus_transform(x):
    # Numerically stable softplus: max(x, 0) + log1p(exp(-|x|)).
    # NOTE(perf, v5e): this issues two transcendentals per element on the single
    # EUP; on v6e/v7x it hides comfortably behind the HBM stream.
    return jnp.maximum(x, 0.0) + jnp.log1p(jnp.exp(-jnp.abs(x)))


_TRANSFORMS = {"exp": _exp_transform, "softplus": _softplus_transform}

_MIN_SPLIT_BYTES = 2 << 20   # split single-tile slabs bigger than this (v7x 2-TC)


# ---------------------------------------------------------------------------
# kernel
# ---------------------------------------------------------------------------
def _noise_transform_kernel(x_ref, o_ref, *, transform):
    # x_ref/o_ref: one (tile_r, cols) lane-dense tile of the noise mean / diag.
    x = x_ref[...].astype(jnp.float32)
    o_ref[...] = transform(x).astype(o_ref.dtype)


# ---------------------------------------------------------------------------
# layout helpers
# ---------------------------------------------------------------------------
def _sublane_unit(dtype):
    itemsize = jnp.dtype(dtype).itemsize
    return {4: 8, 2: 16, 1: 32}.get(itemsize, 8)


def _lane_dense_layout(total, max_tile_cols):
    """Factor a flat length (multiple of 128) as (rows, cols) with cols the
    largest power-of-two multiple of 128 dividing total, capped at
    max_tile_cols.  Pure reshape of the contiguous buffer (zero copy)."""
    cols = 128
    while cols * 2 <= max_tile_cols and total % (cols * 2) == 0:
        cols *= 2
    return total // cols, cols


# ---------------------------------------------------------------------------
# forward
# ---------------------------------------------------------------------------
def heteroskedastic_noise_forward(noise_mean, noise_indices=None, *,
                                  noise_transform="exp",
                                  use_pallas=True,
                                  max_tile_bytes=4 << 20,
                                  max_tile_cols=2048):
    """Mirror of HeteroskedasticNoise.forward.

    noise_mean:    predictive mean of the noise model (MultivariateNormal.mean),
                   shape batch_shape + (n,) [optionally + (num_outputs,)].
    noise_indices: optional index sequence applied to the last dim (mean[..., idx]).
    use_pallas:    if False, apply the transform with plain jnp so XLA can fuse
                   it into the surrounding graph (best when not composed with
                   other custom kernels).
    Returns the diagonal of the DiagLazyTensor, i.e. noise_transform(noise_diag).
    """
    # TODO(synk): the noise_model GP call and MultivariateNormal construction have no
    # Pallas equivalent; this forward consumes the model's predictive mean directly.
    if noise_indices is not None:
        # TODO(synk): gather kept at the wrapper level (XLA fuses it with the mean
        # producer); in-kernel scalar-prefetch gather would narrow the output
        # lane width and re-introduce masked stores for small index sets.
        noise_mean = jnp.take(noise_mean, jnp.asarray(noise_indices, jnp.int32), axis=-1)

    transform = _TRANSFORMS[noise_transform]
    out_shape = noise_mean.shape
    dtype = noise_mean.dtype

    if not use_pallas:
        # Fast path: let XLA fuse the elementwise transform (no extra HBM round trip).
        return transform(noise_mean.astype(jnp.float32)).astype(dtype)

    total = int(np.prod(out_shape)) if len(out_shape) else 1
    if total == 0:
        return jnp.zeros(out_shape, dtype)

    itemsize = jnp.dtype(dtype).itemsize
    unit_r = _sublane_unit(dtype)

    # Flatten; pad the tail up to a multiple of 8*128 so the slab is always
    # lane-dense (unmasked vst), then slice the padding off afterwards.
    flat = noise_mean.reshape(-1)
    pad = (-total) % (8 * 128)
    if pad:
        flat = jnp.pad(flat, (0, pad))
    padded_total = total + pad

    rows, cols = _lane_dense_layout(padded_total, max_tile_cols)
    x2d = flat.reshape(rows, cols)

    # Byte-budgeted sublane tile (~max_tile_bytes per buffer, dtype aware).
    rows_budget = max(unit_r, (max_tile_bytes // (cols * itemsize)) // unit_r * unit_r)
    tile_r = rows if rows <= rows_budget else rows_budget

    # Guarantee >=2 grid steps for medium+ slabs so the "parallel" axis gives
    # both v7x TensorCores work on this HBM-bound stream.
    if (pl.cdiv(rows, tile_r) == 1 and rows > unit_r
            and rows * cols * itemsize > _MIN_SPLIT_BYTES):
        half = ((rows + 1) // 2 + unit_r - 1) // unit_r * unit_r
        if half < rows:
            tile_r = half

    grid = (pl.cdiv(rows, tile_r),)
    kernel = functools.partial(_noise_transform_kernel, transform=transform)

    out2d = pl.pallas_call(
        kernel,
        out_shape=jax.ShapeDtypeStruct((rows, cols), dtype),
        grid=grid,
        in_specs=[pl.BlockSpec((tile_r, cols), lambda i: (i, 0))],
        out_specs=pl.BlockSpec((tile_r, cols), lambda i: (i, 0)),
        compiler_params=pltpu.CompilerParams(
            # 1-D parallel grid over rows -> v7x's 2 TCs both stream the output.
            dimension_semantics=("parallel",),
            # 4 MiB tiles, double-buffered in+out = 16 MiB: raise above v5e's
            # 16 MiB default scoped limit; 32 MiB is within every chip's budget.
            vmem_limit_bytes=32 << 20,
        ),
    )(x2d)

    out_flat = out2d.reshape(-1)
    if pad:
        out_flat = out_flat[:total]
    # TODO(synk): DiagLazyTensor lazy wrapper has no Pallas equivalent; return its diagonal.
    return out_flat.reshape(out_shape)


# ---------------------------------------------------------------------------
# demo / self-test
# ---------------------------------------------------------------------------
if __name__ == "__main__":
    key = jax.random.PRNGKey(0)
    k_x, k_w, k_b, k_m, k_s = jax.random.split(key, 5)

    # Stand-in noise model: deterministic linear predictive mean.
    # TODO(synk): the real noise_model is an arbitrary gpytorch GP returning a
    # MultivariateNormal; only its mean feeds this forward pass.
    batch, n, d = 2, 16, 32
    x = jax.random.normal(k_x, (batch, n, d), dtype=jnp.float32)
    w = 0.1 * jax.random.normal(k_w, (d,), dtype=jnp.float32)
    b = 0.1 * jax.random.normal(k_b, (), dtype=jnp.float32)
    noise_mean = x @ w + b                                   # (batch, n) ~ output.mean

    # 1) default path: noise_indices=None, noise_transform=exp
    #    (total=32 -> padded lane-dense slab; no masked narrow stores)
    noise_diag = jax.block_until_ready(heteroskedastic_noise_forward(noise_mean))
    ref = jnp.exp(noise_mean)
    assert noise_diag.shape == (batch, n), noise_diag.shape
    np.testing.assert_allclose(np.asarray(noise_diag), np.asarray(ref), rtol=1e-6, atol=1e-6)

    # 2) noise_indices path on a multi-output mean (mean[..., noise_indices])
    mean_mo = 0.1 * jax.random.normal(k_m, (batch, n, 4), dtype=jnp.float32)
    idx = (1, 3)
    out_idx = jax.block_until_ready(
        heteroskedastic_noise_forward(mean_mo, noise_indices=idx)
    )
    ref_idx = jnp.exp(mean_mo[..., jnp.asarray(idx)])
    assert out_idx.shape == (batch, n, len(idx)), out_idx.shape
    np.testing.assert_allclose(np.asarray(out_idx), np.asarray(ref_idx), rtol=1e-6, atol=1e-6)

    # 3) softplus transform on a wider slab (exercises cols>128 re-factoring)
    mean_sp = jax.random.normal(k_s, (4, 1024), dtype=jnp.float32)
    out_sp = jax.block_until_ready(
        heteroskedastic_noise_forward(mean_sp, noise_transform="softplus")
    )
    ref_sp = jax.nn.softplus(mean_sp)
    np.testing.assert_allclose(np.asarray(out_sp), np.asarray(ref_sp), rtol=1e-6, atol=1e-6)

    # 4) non-Pallas fused fast path agrees with the kernel
    out_fast = jax.block_until_ready(
        heteroskedastic_noise_forward(noise_mean, use_pallas=False)
    )
    np.testing.assert_allclose(np.asarray(out_fast), np.asarray(noise_diag),
                               rtol=1e-6, atol=1e-6)

    print("KERNEL_OK")
</pallas_src>

<mosaic_0001>
module attributes {stable_mosaic.version = 11 : i64} {
  func.func @_noise_transform_kernel(%arg0: i32, %arg1: memref<1x1024xf32, #tpu.memory_space<vmem>>, %arg2: memref<1x1024xf32, #tpu.memory_space<vmem>>) attributes {dimension_semantics = [#tpu.dimension_semantics<parallel>], iteration_bounds = array<i64: 1>, scalar_prefetch = 0 : i64, scratch_operands = 0 : i64, tpu.core_type = #tpu.core_type<tc>, window_params = [{transform_indices = @transform_0, window_bounds = array<i64: 1, 1024>}, {transform_indices = @transform_1, window_bounds = array<i64: 1, 1024>}]} {
    %c0 = arith.constant 0 : index
    %c0_0 = arith.constant 0 : index
    %0 = vector.load %arg1[%c0, %c0_0] : memref<1x1024xf32, #tpu.memory_space<vmem>>, vector<1x1024xf32>
    %1 = math.exp %0 : vector<1x1024xf32>
    %c0_1 = arith.constant 0 : index
    %c0_2 = arith.constant 0 : index
    %2 = vector.load %arg2[%c0_1, %c0_2] : memref<1x1024xf32, #tpu.memory_space<vmem>>, vector<1x1024xf32>
    tpu.vector_store %arg2[%c0_1, %c0_2], %1 {strides = array<i32>} : memref<1x1024xf32, #tpu.memory_space<vmem>>, vector<1x1024xf32>,
    return
  }
  func.func @transform_0(%arg0: i32) -> (i32, i32) {
    %c0_i32 = arith.constant 0 : i32
    %c0_i32_0 = arith.constant 0 : i32
    return %arg0, %c0_i32 : i32, i32
  }
  func.func @transform_1(%arg0: i32) -> (i32, i32) {
    %c0_i32 = arith.constant 0 : i32
    %c0_i32_0 = arith.constant 0 : i32
    return %arg0, %c0_i32 : i32, i32
  }
}

</mosaic_0001>

<bundles_post_ra>
// kernel: tpu_custom_call.1
= control target key start
LH: loop header
LB: loop body
LE: loop exit
PB: predicated region body
PF: predicated region fallthrough
CT: control target
= control target key end

     0   :  { %6 = vsyncpa [#allocation3], 0  ;;  %s128_s0 = inlined_call_operand.hbm [shape: f32[1,1024], index: 0, kind: input, shape index: {}]   ;;  %s129_s1 = inlined_call_operand.hbm [shape: f32[1,1024], index: 1, kind: output, shape index: {}]  }
   0x1   :  { %7 = vsyncpa [#allocation4], 0  ;;  %s92_s6 = smov [#allocation2]   ;;  %s44_s10 = scalar_lea.hbm %s128_s0, 128 }
   0x2   :  { %s14_s7 = sshll.u32 %s92_s6, 4  ;;  %p45_p0 = scmp.ne.s32.totalorder %s128_s0, %s44_s10  ;;  %s15_s7 = int_to_ptr.vmem [resolvable:$true] %s14_s7 }
   0x3   :  { %p48_p1 = scmp.lt.u32.totalorder %s44_s10, %s128_s0 }
   0x5   :  { %p50_p2 = pnand %p48_p1, %p45_p0 }
   0x7   :  { %53 = shalt.err (!%p50_p2)
}
   0x8   :  { %s54_s15 = scalar_lea.vmem %s15_s7, 128  ;;  %p59_p4 = scmp.lt.s32.totalorder %s15_s7, %s15_s7 }
   0x9   :  { %p55_p3 = scmp.ne.s32.totalorder %s15_s7, %s54_s15  ;;  %p60_p5 = scmp.lt.s32.totalorder %s54_s15, %s54_s15 }
   0xb   :  { %p61_p6 = por %p60_p5, %p59_p4 }
   0xd   :  { %p62_p7 = pnand %p61_p6, %p55_p3 }
   0xf   :  { %65 = shalt.err (!%p62_p7)
}
  0x10   :  { %17 = dma.hbm_to_vmem [thread:$0]  %s128_s0, 128, %s15_s7, [#allocation3]  }
  0x11   :  { %88 = dma.done.wait [#allocation3], 128  }
  0x12   :  { %89 = vsyncadd [#allocation3], 4294967168  ;;  %v21_v0 = vld [vmem:[#allocation2] sm:$0xff]  ;;  %s93_s18 = smov [#allocation5]  }
  0x13   :  { %v22_v1 = vmul.f32 1.442695, %v21_v0  ;;  %s31_s19 = sshll.u32 %s93_s18, 4  ;;  %s32_s19 = int_to_ptr.vmem [resolvable:$true] %s31_s19 }
  0x14   :  { %s66_s20 = scalar_lea.vmem %s32_s19, 128  ;;  %p71_p9 = scmp.lt.s32.totalorder %s32_s19, %s32_s19 }
  0x15   :  { %42 = vpow2.f32 %v22_v1  ;;  %p67_p8 = scmp.ne.s32.totalorder %s32_s19, %s66_s20  ;;  %p72_p10 = scmp.lt.s32.totalorder %s66_s20, %s66_s20 }
  0x17   :  { %p73_p11 = por %p72_p10, %p71_p9 }
  0x19   :  { %p74_p12 = pnand %p73_p11, %p67_p8 }
  0x1f   :  { %v43_v2 = vpop.eup %42 }
  0x20   :  { %24 = vst [vmem:[#allocation5] sm:$0xff] %v43_v2 }
  0x21   :  { %77 = shalt.err (!%p74_p12)
}
  0x22   :  { %s78_s0 = scalar_lea.hbm %s129_s1, 128 }
  0x23   :  { %p79_p13 = scmp.ne.s32.totalorder %s129_s1, %s78_s0  ;;  %p82_p0 = scmp.lt.u32.totalorder %s78_s0, %s129_s1 }
  0x25   :  { %p84_p1 = pnand %p82_p0, %p79_p13 }
  0x27   :  { %87 = shalt.err (!%p84_p1)
}
  0x28   :  { %34 = dma.vmem_to_hbm [thread:$0]  %s32_s19, 128, %s129_s1, [#allocation4]  }
  0x29   :  { %90 = dma.done.wait [#allocation4], 128  }
  0x2a   :  { %91 = vsyncadd [#allocation4], 4294967168 }
  0x2b   :  { %38 = vsyncpa [#allocation3], 1 }
  0x2c   :  { %39 = vsyncpa [#allocation4], 1 }

</bundles_post_ra>
